<compile_context>
chip_gen: v7x
topology: tpu7x:2x2x1
jax: 0.10.0
libtpu: 0.0.40
codegen_flags: <defaults>
</compile_context>

<pallas_src>
import math
import functools

import jax
import jax.numpy as jnp
from jax.experimental import pallas as pl
from jax.experimental.pallas import tpu as pltpu


_TARGET_X_TILE_BYTES = 8 * 1024 * 1024   # ~8 MiB of x per grid step (perf review item 1)


# ----------------------------------------------------------------------------
# Parameter setup (plain JAX glue): the `pe` buffer from __init__.
# ----------------------------------------------------------------------------
def make_positional_encoding_buffer(d_model: int, max_len: int = 5000,
                                    dtype=jnp.float32) -> jnp.ndarray:
    position = jnp.arange(max_len, dtype=jnp.float32)[:, None]                 # [max_len, 1]
    div_term = jnp.exp(
        jnp.arange(0, d_model, 2, dtype=jnp.float32) * (-math.log(10000.0) / d_model))
    pe = jnp.zeros((max_len, 1, d_model), dtype=jnp.float32)
    pe = pe.at[:, 0, 0::2].set(jnp.sin(position * div_term))
    pe = pe.at[:, 0, 1::2].set(jnp.cos(position * div_term))
    # Store in the model dtype so the forward pass needs no per-call cast.
    return pe.astype(dtype)


# ----------------------------------------------------------------------------
# Pallas kernels (elementwise, HBM-bandwidth bound).
# ----------------------------------------------------------------------------
def _pos_enc_kernel(x_ref, pe_ref, o_ref):
    # Works for both layouts: x (ts,tb,D) + pe (ts,1,D) broadcast, or (ts,C)+(ts,C).
    o_ref[...] = x_ref[...] + pe_ref[...]


def _pos_enc_dropout_prng_kernel(x_ref, pe_ref, seed_ref, o_ref, *,
                                 keep_threshold, inv_keep):
    # Inverted dropout via the TPU hardware PRNG: keep iff bits >= round(p*2^32)
    # (single uint32 compare, no f32 uniform construction).
    # TODO(synk): cannot reproduce torch's RNG stream bit-for-bit (semantics match).
    y = x_ref[...] + pe_ref[...]
    tile_id = pl.program_id(0) * pl.num_programs(1) + pl.program_id(1)
    # Mix seed and tile id through the PRNG's own folding -> independent streams
    # per (seed, tile); no overlap between consecutive seeds.
    pltpu.prng_seed(seed_ref[0], tile_id)
    bits = pltpu.prng_random_bits(y.shape)
    if bits.dtype != jnp.uint32:
        bits = pltpu.bitcast(bits, jnp.uint32)
    keep = bits >= jnp.uint32(keep_threshold)
    # Scale in f32, cast at the store (avoids bf16 rounding of 1/(1-p)).
    o_ref[...] = jnp.where(keep, y.astype(jnp.float32) * inv_keep, 0.0).astype(o_ref.dtype)


def _pos_enc_dropout_mask_kernel(x_ref, pe_ref, m_ref, o_ref, *, inv_keep):
    # Portable fallback (non-TPU / interpret backends): keep mask precomputed
    # outside the kernel and streamed in as uint8.
    y = x_ref[...] + pe_ref[...]
    keep = m_ref[...] != 0
    o_ref[...] = jnp.where(keep, y.astype(jnp.float32) * inv_keep, 0.0).astype(o_ref.dtype)


# ----------------------------------------------------------------------------
# Tiling / VMEM helpers.
# ----------------------------------------------------------------------------
def _round_down(v: int, m: int) -> int:
    return (v // m) * m


def _round_up(v: int, m: int) -> int:
    return ((v + m - 1) // m) * m


def _vmem_budgets():
    """(vmem_limit_cap, tile_footprint_budget) in bytes, generation-aware."""
    try:
        physical = int(pltpu.get_tpu_info().vmem_capacity_bytes)
        if physical <= 0:
            raise ValueError("bad vmem capacity")
    except Exception:
        physical = 64 * 1024 * 1024          # v7x per-TC VMEM: most conservative
    limit_cap = (physical * 3) // 4           # never request > ~75% of physical
    tile_budget = (limit_cap * 2) // 3        # headroom inside the requested limit
    return limit_cap, tile_budget


# ----------------------------------------------------------------------------
# Wrapper.
# ----------------------------------------------------------------------------
def positional_encoding(x, pe, *, p: float = 0.1, training: bool = False, seed: int = 0):
    """x: [S, B, D]; pe: [max_len, 1, D] (max_len >= S). Returns dropout(x + pe[:S])."""
    s, b, d = x.shape
    assert pe.ndim == 3 and pe.shape[1] == 1 and pe.shape[2] == d and pe.shape[0] >= s
    if pe.dtype != x.dtype:
        pe = pe.astype(x.dtype)   # fallback only; prefer building pe in the model dtype

    training = bool(training) and p > 0.0
    if training:
        assert 0.0 < p < 1.0, "dropout p must be in [0, 1) (p >= 1 would divide by zero)"
    on_tpu = jax.devices()[0].platform == "tpu"
    use_prng = training and on_tpu        # in-kernel HW PRNG: no extra HBM traffic
    use_mask = training and not on_tpu    # portable fallback (interpret / CPU backends)

    itm = jnp.dtype(x.dtype).itemsize
    limit_cap, tile_budget = _vmem_budgets()

    # ---- layout + tiling -----------------------------------------------------
    lane_dense_batch = (b >= 8) and (b % 8 == 0)

    if lane_dense_batch:
        # 3D layout: blocks (ts, tb, D); pe block (ts, 1, D) broadcast over batch
        # inside VMEM (keeps pe HBM traffic tiny).
        x_row = b * d * itm
        per_row = 2 * x_row + d * itm + (b * d if use_mask else 0)   # x+out+pe(+mask)
        ts = min(s, max(1, _TARGET_X_TILE_BYTES // x_row),
                 max(1, tile_budget // (2 * per_row)))
        tb = b
        if ts == 1 and (x_row > _TARGET_X_TILE_BYTES or 2 * per_row > tile_budget):
            # Even one sequence row blows the budget: also split the batch axis.
            # TODO(synk): D itself is never split; a single (1, 8, D) block with an
            # enormous D could still exceed VMEM.
            per_b = 2 * d * itm + (d if use_mask else 0)
            tb = min(b, max(1, _TARGET_X_TILE_BYTES // (d * itm)),
                     max(1, (tile_budget // 2 - d * itm) // per_b))
            tb = min(b, max(8, _round_down(tb, 8)))    # second-to-minor multiple of 8
        nb = pl.cdiv(b, tb)
        ns = pl.cdiv(s, ts)
        if ns * nb == 1 and s >= 2:
            ns = 2                                     # give both v7x TensorCores work
        ts = pl.cdiv(s, ns)                            # balanced tiles, no straggler
        ns = pl.cdiv(s, ts)
        grid = (ns, nb)

        x_kern, pe_kern = x, pe
        kern_out_shape = (s, b, d)
        x_spec = pl.BlockSpec((ts, tb, d), lambda i, j: (i, j, 0))
        pe_spec = pl.BlockSpec((ts, 1, d), lambda i, j: (i, 0, 0))
        out_spec = pl.BlockSpec((ts, tb, d), lambda i, j: (i, j, 0))
        x_tile_bytes = ts * tb * d * itm
        pe_tile_bytes = ts * d * itm
        mask_tile_bytes = ts * tb * d if use_mask else 0
    else:
        # Small / odd batch: fold (B, D) into one lane-dense axis (review item 4).
        # pe is pre-tiled across batch in the wrapper (cheap since B is small).
        c = b * d
        x_kern = x.reshape(s, c)
        pe_kern = jnp.tile(pe[:s, 0, :], (1, b))       # [s, B*D]; column b*D+k == pe[:, k]
        x_row = c * itm
        per_row = 3 * x_row + (c if use_mask else 0)   # x + pe + out (+mask)
        ts = min(s, max(1, _TARGET_X_TILE_BYTES // x_row),
                 max(1, tile_budget // (2 * per_row)))
        tc = c
        if ts == 1 and (x_row > _TARGET_X_TILE_BYTES or 2 * per_row > tile_budget):
            per_col = 3 * itm + (1 if use_mask else 0)
            tc = min(c, max(1, _TARGET_X_TILE_BYTES // itm),
                     max(1, tile_budget // (2 * per_col)))
            tc = min(c, max(128, _round_down(tc, 128)))  # lane-aligned column groups
        nc = pl.cdiv(c, tc)
        ns = pl.cdiv(s, ts)
        if ns * nc == 1 and s >= 2:
            ns = 2
        ts = pl.cdiv(s, ns)
        if ts < s:                                      # (8,128) rule on 2nd-minor dim
            ts = min(s, _round_up(ts, 8))
        ns = pl.cdiv(s, ts)
        grid = (ns, nc)

        kern_out_shape = (s, c)
        x_spec = pl.BlockSpec((ts, tc), lambda i, j: (i, j))
        pe_spec = pl.BlockSpec((ts, tc), lambda i, j: (i, j))
        out_spec = pl.BlockSpec((ts, tc), lambda i, j: (i, j))
        x_tile_bytes = ts * tc * itm
        pe_tile_bytes = ts * tc * itm
        mask_tile_bytes = ts * tc if use_mask else 0

    # ---- VMEM budget for the chosen tiles (double-buffered in/out) -----------
    footprint = 2 * (2 * x_tile_bytes + pe_tile_bytes + mask_tile_bytes)
    if use_prng:
        footprint += (x_tile_bytes // itm) * 4          # uint32 random-bits temporary
    vmem_limit = int(min(limit_cap, max(16 * 1024 * 1024, footprint + footprint // 2)))

    compiler_params = pltpu.CompilerParams(
        dimension_semantics=("parallel", "parallel"),
        vmem_limit_bytes=vmem_limit,
    )

    def run(kernel, extra_inputs, extra_specs):
        out = pl.pallas_call(
            kernel,
            out_shape=jax.ShapeDtypeStruct(kern_out_shape, x.dtype),
            grid=grid,
            in_specs=[x_spec, pe_spec] + list(extra_specs),
            out_specs=out_spec,
            input_output_aliases={0: 0},               # reuse x's buffer for the output
            compiler_params=compiler_params,
        )(x_kern, pe_kern, *extra_inputs)
        return out.reshape(s, b, d)

    if not training:
        return run(_pos_enc_kernel, (), ())

    inv_keep = 1.0 / (1.0 - p)
    if use_prng:
        keep_threshold = min(int(round(p * 2.0 ** 32)), 2 ** 32 - 1)
        kernel = functools.partial(_pos_enc_dropout_prng_kernel,
                                   keep_threshold=keep_threshold, inv_keep=inv_keep)
        seed_arr = jnp.asarray([seed], dtype=jnp.int32)
        seed_spec = pl.BlockSpec(memory_space=pltpu.MemorySpace.SMEM)
        return run(kernel, (seed_arr,), (seed_spec,))

    # TODO(synk): non-TPU backends (e.g. the interpret harness) cannot lower the
    # TPU hardware PRNG; stream a precomputed uint8 keep-mask instead.
    kernel = functools.partial(_pos_enc_dropout_mask_kernel, inv_keep=inv_keep)
    keep = jax.random.bernoulli(jax.random.PRNGKey(seed), 1.0 - p, (s, b, d))
    keep = keep.astype(jnp.uint8).reshape(kern_out_shape)
    return run(kernel, (keep,), (x_spec,))


# ----------------------------------------------------------------------------
# Demo / self-check.
# ----------------------------------------------------------------------------
if __name__ == "__main__":
    p_drop = 0.1

    def check(d_model, seq_len, batch, max_len, seed):
        key = jax.random.PRNGKey(0)
        x = jax.random.normal(key, (seq_len, batch, d_model), dtype=jnp.float32)
        pe = make_positional_encoding_buffer(d_model, max_len, dtype=x.dtype)
        ref = x + pe[:seq_len]                     # computed before any aliased call

        # Eval-mode forward (dropout is identity, matching module.eval()).
        out_eval = jax.block_until_ready(
            positional_encoding(x, pe, p=p_drop, training=False))
        assert out_eval.shape == x.shape and out_eval.dtype == x.dtype
        assert jnp.allclose(out_eval, ref, atol=1e-6, rtol=1e-6)

        # Training-mode forward: every element is either 0 (dropped) or the
        # positionally-encoded value scaled by 1/(1-p).
        out_train = jax.block_until_ready(
            positional_encoding(x, pe, p=p_drop, training=True, seed=seed))
        scaled = ref / (1.0 - p_drop)
        ok = (out_train == 0) | (jnp.abs(out_train - scaled)
                                 <= 1e-5 * (1.0 + jnp.abs(scaled)))
        assert bool(jnp.all(ok))

    # Small / odd batch -> lane-dense 2D path.
    check(d_model=32, seq_len=8, batch=2, max_len=64, seed=1234)
    # Multiple-of-8 batch, 128-wide embed -> 3D path.
    check(d_model=128, seq_len=16, batch=8, max_len=32, seed=7)

    print("KERNEL_OK")
</pallas_src>

<mosaic_0001>
module attributes {stable_mosaic.version = 11 : i64} {
  func.func @_pos_enc_kernel(%arg0: i32, %arg1: i32, %arg2: memref<8x64xf32, #tpu.memory_space<vmem>>, %arg3: memref<8x64xf32, #tpu.memory_space<vmem>>, %arg4: memref<8x64xf32, #tpu.memory_space<vmem>>) attributes {dimension_semantics = [#tpu.dimension_semantics<parallel>, #tpu.dimension_semantics<parallel>], iteration_bounds = array<i64: 1, 1>, scalar_prefetch = 0 : i64, scratch_operands = 0 : i64, tpu.core_type = #tpu.core_type<tc>, window_params = [{transform_indices = @transform_0, window_bounds = array<i64: 8, 64>}, {transform_indices = @transform_1, window_bounds = array<i64: 8, 64>}, {transform_indices = @transform_2, window_bounds = array<i64: 8, 64>}]} {
    %c0 = arith.constant 0 : index
    %c0_0 = arith.constant 0 : index
    %0 = vector.load %arg2[%c0, %c0_0] : memref<8x64xf32, #tpu.memory_space<vmem>>, vector<8x64xf32>
    %c0_1 = arith.constant 0 : index
    %c0_2 = arith.constant 0 : index
    %1 = vector.load %arg3[%c0_1, %c0_2] : memref<8x64xf32, #tpu.memory_space<vmem>>, vector<8x64xf32>
    %2 = arith.addf %0, %1 : vector<8x64xf32>
    %c0_3 = arith.constant 0 : index
    %c0_4 = arith.constant 0 : index
    %3 = vector.load %arg4[%c0_3, %c0_4] : memref<8x64xf32, #tpu.memory_space<vmem>>, vector<8x64xf32>
    tpu.vector_store %arg4[%c0_3, %c0_4], %2 {strides = array<i32>} : memref<8x64xf32, #tpu.memory_space<vmem>>, vector<8x64xf32>,
    return
  }
  func.func @transform_0(%arg0: i32, %arg1: i32) -> (i32, i32) {
    %c0_i32 = arith.constant 0 : i32
    return %arg0, %arg1 : i32, i32
  }
  func.func @transform_1(%arg0: i32, %arg1: i32) -> (i32, i32) {
    %c0_i32 = arith.constant 0 : i32
    return %arg0, %arg1 : i32, i32
  }
  func.func @transform_2(%arg0: i32, %arg1: i32) -> (i32, i32) {
    %c0_i32 = arith.constant 0 : i32
    return %arg0, %arg1 : i32, i32
  }
}

</mosaic_0001>

<bundles_post_ra>
// kernel: tpu_custom_call.1
= control target key start
LH: loop header
LB: loop body
LE: loop exit
PB: predicated region body
PF: predicated region fallthrough
CT: control target
= control target key end

     0   :  { %7 = vsyncpa [#allocation3], 0  ;;  %s138_s0 = inlined_call_operand.hbm [shape: f32[8,64], index: 0, kind: input, shape index: {}, may-alias: {0,2}]   ;;  %s139_s1 = inlined_call_operand.vmem [shape: f32[8,64], index: 1, kind: input, shape index: {}]   ;;  %s140_s2 = inlined_call_operand.hbm [shape: f32[8,64], index: 2, kind: output, shape index: {}, may-alias: {0,2}]  }
   0x1   :  { %8 = vsyncpa [#allocation4], 0  ;;  %s94_s9 = smov [#allocation2]   ;;  %s46_s13 = scalar_lea.hbm %s138_s0, 128 }
   0x2   :  { %s15_s10 = sshll.u32 %s94_s9, 4  ;;  %p47_p0 = scmp.ne.s32.totalorder %s138_s0, %s46_s13  ;;  %s16_s10 = int_to_ptr.vmem [resolvable:$true] %s15_s10 }
   0x3   :  { %p50_p1 = scmp.lt.u32.totalorder %s46_s13, %s138_s0 }
   0x5   :  { %p52_p2 = pnand %p50_p1, %p47_p0 }
   0x7   :  { %55 = shalt.err (!%p52_p2)
}
   0x8   :  { %s56_s18 = scalar_lea.vmem %s16_s10, 128  ;;  %p61_p4 = scmp.lt.s32.totalorder %s16_s10, %s16_s10 }
   0x9   :  { %p57_p3 = scmp.ne.s32.totalorder %s16_s10, %s56_s18  ;;  %p62_p5 = scmp.lt.s32.totalorder %s56_s18, %s56_s18 }
   0xb   :  { %p63_p6 = por %p62_p5, %p61_p4 }
   0xd   :  { %p64_p7 = pnand %p63_p6, %p57_p3 }
   0xf   :  { %67 = shalt.err (!%p64_p7)
}
  0x10   :  { %18 = dma.hbm_to_vmem [thread:$0]  %s138_s0, 128, %s16_s10, [#allocation3]  }
  0x11   :  { %90 = dma.done.wait [#allocation3], 128  }
  0x12   :  { %91 = vsyncadd [#allocation3], 4294967168  ;;  %s95_s21 = smov [#allocation5]   ;;  %v24_v0 = vld [vmem:[#allocation2] sm:$0xff]  ;;  %vm27_vm0 = vcmask 523264  }
  0x13   :  { %s35_s22 = sshll.u32 %s95_s21, 4  ;;  %v25_v1 = vld [vmem:[%s139_s1] sm:$0xff]  ;;  %s36_s22 = int_to_ptr.vmem [resolvable:$true] %s35_s22 }
  0x14   :  { %v26_v2 = vadd.f32 %v25_v1, %v24_v0  ;;  %s68_s25 = scalar_lea.vmem %s36_s22, 128  ;;  %p73_p9 = scmp.lt.s32.totalorder %s36_s22, %s36_s22 }
  0x15   :  { %p69_p8 = scmp.ne.s32.totalorder %s36_s22, %s68_s25  ;;  %p74_p10 = scmp.lt.s32.totalorder %s68_s25, %s68_s25 }
  0x16   :  { %28 = vst.msk [vmem:[#allocation5] sm:$0xff] %vm27_vm0, %v26_v2 }
  0x17   :  { %p75_p11 = por %p74_p10, %p73_p9 }
  0x19   :  { %p76_p12 = pnand %p75_p11, %p69_p8 }
  0x1b   :  { %79 = shalt.err (!%p76_p12)
}
  0x1c   :  { %s80_s27 = scalar_lea.hbm %s140_s2, 128 }
  0x1d   :  { %p81_p13 = scmp.ne.s32.totalorder %s140_s2, %s80_s27  ;;  %p84_p0 = scmp.lt.u32.totalorder %s80_s27, %s140_s2 }
  0x1f   :  { %p86_p1 = pnand %p84_p0, %p81_p13 }
  0x21   :  { %89 = shalt.err (!%p86_p1)
}
  0x22   :  { %38 = dma.vmem_to_hbm [thread:$0]  %s36_s22, 128, %s140_s2, [#allocation4]  }
  0x23   :  { %92 = dma.done.wait [#allocation4], 128  }
  0x24   :  { %93 = vsyncadd [#allocation4], 4294967168 }
  0x25   :  { %42 = vsyncpa [#allocation3], 1 }
  0x26   :  { %43 = vsyncpa [#allocation4], 1 }

</bundles_post_ra>
